<compile_context>
chip_gen: v5e
topology: v5e:2x2
jax: 0.10.0
libtpu: 0.0.40
codegen_flags: <defaults>
</compile_context>

<pallas_src>
import functools

import jax
import jax.numpy as jnp
import numpy as np
from jax import lax
from jax.experimental import pallas as pl
from jax.experimental.pallas import tpu as pltpu

LANES = 128


def _mlp_kernel(a_ref, c_ref, w2_ref, b2_ref, x_ref, o_ref, *,
                hidden, n_pos, chunk_rows, folded):
    """One grid step over a (tile_rows, 128) lane-dense batch tile.

    a_ref/c_ref/w2_ref: (H_pad, 128) f32 VMEM, row j = lane-replicated scalar.
      folded=True : a = w1*w2, c = b1*w2; units [0, n_pos) have w2 >= 0,
                    units [n_pos, hidden) have w2 < 0; w2_ref unused.
      folded=False: a = w1, c = b1; w2_ref holds w2.
    b2_ref: (1,) f32 SMEM.
    """
    tile_rows = x_ref.shape[0]
    n_chunks = tile_rows // chunk_rows
    b2 = b2_ref[0]

    def compute_chunk(off):
        x = x_ref[pl.ds(off, chunk_rows), :]
        # Two independent accumulator chains (latency hiding); b2 folded into
        # chain 0's init so there is no separate "+ b2" pass over the tile.
        acc0 = jnp.full((chunk_rows, LANES), b2, jnp.float32)
        acc1 = jnp.zeros((chunk_rows, LANES), jnp.float32)
        if folded:
            for j in range(n_pos):              # w2_j >= 0: relu(z)*w2 = max(a*x+c, 0)
                acc0 = acc0 + jnp.maximum(
                    x * a_ref[j:j + 1, :] + c_ref[j:j + 1, :], 0.0)
            for j in range(n_pos, hidden):      # w2_j <  0: relu(z)*w2 = min(a*x+c, 0)
                acc1 = acc1 + jnp.minimum(
                    x * a_ref[j:j + 1, :] + c_ref[j:j + 1, :], 0.0)
        else:
            for j in range(hidden):             # general form (traced weights)
                h = jnp.maximum(x * a_ref[j:j + 1, :] + c_ref[j:j + 1, :], 0.0)
                if j % 2 == 0:
                    acc0 = acc0 + h * w2_ref[j:j + 1, :]
                else:
                    acc1 = acc1 + h * w2_ref[j:j + 1, :]
        o_ref[pl.ds(off, chunk_rows), :] = acc0 + acc1

    if n_chunks == 1:
        compute_chunk(0)
    else:
        if n_chunks % 4 == 0:
            unroll = 4
        elif n_chunks % 2 == 0:
            unroll = 2
        elif n_chunks <= 8:
            unroll = True
        else:
            unroll = 1

        def body(ci, carry):
            off = pl.multiple_of(ci * chunk_rows, chunk_rows)
            compute_chunk(off)
            return carry

        lax.fori_loop(0, n_chunks, body, 0, unroll=unroll)


def _round_up(v, m):
    return ((v + m - 1) // m) * m


def _pick_chunk_rows(tile_rows):
    for c in (32, 16, 8):               # <=4 vregs per chain (v5e-friendly)
        if tile_rows % c == 0:
            return c
    return tile_rows                    # tiny tiles (< 8 rows): single chunk


def net_forward(x, w1, b1, w2, b2, *, tile_rows=1024):
    """Forward pass of Net.  x: (N, 1) f32 -> (N, 1) f32.

    Params (PyTorch-equivalent, stored flat):
      w1: (H,) = hidden.weight[:, 0]    b1: (H,) = hidden.bias
      w2: (H,) = predict.weight[0, :]   b2: (1,)  = predict.bias
    """
    n = int(x.shape[0])
    hidden = int(w1.shape[0])
    h_pad = _round_up(hidden, 8)

    # ---- Fold predict layer into hidden layer when weights are concrete. ----
    try:
        w1_np = np.asarray(w1, dtype=np.float32)
        b1_np = np.asarray(b1, dtype=np.float32)
        w2_np = np.asarray(w2, dtype=np.float32)
        folded = True
    except (TypeError, jax.errors.TracerArrayConversionError,
            jax.errors.ConcretizationTypeError):
        folded = False

    if folded:
        pos = w2_np >= 0.0
        order = np.concatenate([np.nonzero(pos)[0], np.nonzero(~pos)[0]])
        n_pos = int(pos.sum())
        a_np = (w1_np * w2_np)[order]
        c_np = (b1_np * w2_np)[order]

        def _rep(v_np):
            out = np.zeros((h_pad, LANES), np.float32)
            out[:hidden, :] = v_np[:, None]
            return jnp.asarray(out)

        a2d, c2d, w2_2d = _rep(a_np), _rep(c_np), _rep(w2_np[order])
    else:
        n_pos = hidden

        def _rep_traced(v):
            v = jnp.reshape(v.astype(jnp.float32), (hidden, 1))
            v = jnp.pad(v, ((0, h_pad - hidden), (0, 0)))
            return jnp.broadcast_to(v, (h_pad, LANES))

        a2d, c2d, w2_2d = _rep_traced(w1), _rep_traced(b1), _rep_traced(w2)

    b2v = jnp.reshape(b2, (1,)).astype(jnp.float32)

    # ---- Lane-dense batch layout: zero host copies when N % 128 == 0. ----
    rows = pl.cdiv(n, LANES)
    n_flat = rows * LANES
    xf = jnp.reshape(x, (-1,)).astype(jnp.float32)
    if n_flat != n:
        xf = jnp.pad(xf, (0, n_flat - n))       # only copy when N % 128 != 0
    x2d = jnp.reshape(xf, (rows, LANES))

    # ---- Row tiling: big tiles, but always >=2 grid steps (v7x megacore). ----
    tile_rows = max(8, (int(tile_rows) // 8) * 8)
    if rows >= 16:
        tile_rows = min(tile_rows, max(8, ((rows // 2) // 8) * 8))
    else:
        tile_rows = rows                        # single, full-array block
    grid = (pl.cdiv(rows, tile_rows),)          # ragged last block handled by Pallas
    chunk_rows = _pick_chunk_rows(tile_rows)

    kernel = functools.partial(_mlp_kernel, hidden=hidden, n_pos=n_pos,
                               chunk_rows=chunk_rows, folded=folded)

    out2d = pl.pallas_call(
        kernel,
        out_shape=jax.ShapeDtypeStruct((rows, LANES), jnp.float32),
        grid=grid,
        in_specs=[
            pl.BlockSpec((h_pad, LANES), lambda i: (0, 0)),          # a
            pl.BlockSpec((h_pad, LANES), lambda i: (0, 0)),          # c
            pl.BlockSpec((h_pad, LANES), lambda i: (0, 0)),          # w2
            pl.BlockSpec(memory_space=pltpu.MemorySpace.SMEM),       # b2 scalar
            pl.BlockSpec((tile_rows, LANES), lambda i: (i, 0)),      # x tiles
        ],
        out_specs=pl.BlockSpec((tile_rows, LANES), lambda i: (i, 0)),
        compiler_params=pltpu.CompilerParams(
            dimension_semantics=("parallel",)),    # megacore sharding on v7x
    )(a2d, c2d, w2_2d, b2v, x2d)

    if n_flat != n:
        return jnp.reshape(jnp.reshape(out2d, (-1,))[:n], (n, 1))
    return jnp.reshape(out2d, (n, 1))


def init_params(key, hidden=20):
    """PyTorch nn.Linear default init: U(-1/sqrt(fan_in), 1/sqrt(fan_in))."""
    k1, k2, k3, k4 = jax.random.split(key, 4)
    w1 = jax.random.uniform(k1, (hidden,), jnp.float32, -1.0, 1.0)   # fan_in = 1
    b1 = jax.random.uniform(k2, (hidden,), jnp.float32, -1.0, 1.0)
    bound = 1.0 / float(np.sqrt(hidden))
    w2 = jax.random.uniform(k3, (hidden,), jnp.float32, -bound, bound)
    b2 = jax.random.uniform(k4, (1,), jnp.float32, -bound, bound)
    return w1, b1, w2, b2


def reference_forward(x, w1, b1, w2, b2):
    h = jnp.maximum(x * w1[None, :] + b1[None, :], 0.0)   # (N, H)
    return h @ w2[:, None] + b2                            # (N, 1)


if __name__ == "__main__":
    key = jax.random.PRNGKey(0)
    kx, kp = jax.random.split(key)
    w1, b1, w2, b2 = init_params(kp)

    # 1) Ragged batch (not a multiple of 128): exercises padding + ragged block.
    n1 = 2000
    x1 = jax.random.normal(kx, (n1, 1), jnp.float32)
    out1 = jax.block_until_ready(net_forward(x1, w1, b1, w2, b2))
    ref1 = reference_forward(x1, w1, b1, w2, b2)
    assert out1.shape == (n1, 1)
    assert jnp.allclose(out1, ref1, atol=1e-5, rtol=1e-5)

    # 2) Lane-aligned batch: zero-copy in/out, 2 grid steps, multi-chunk loop.
    n2 = 65536
    x2 = jax.random.normal(jax.random.fold_in(kx, 1), (n2, 1), jnp.float32)
    out2 = jax.block_until_ready(net_forward(x2, w1, b1, w2, b2))
    ref2 = reference_forward(x2, w1, b1, w2, b2)
    assert out2.shape == (n2, 1)
    assert jnp.allclose(out2, ref2, atol=1e-5, rtol=1e-5)

    # 3) Jitted with traced weights: exercises the general (unfolded) fallback.
    out3 = jax.block_until_ready(jax.jit(net_forward)(x1, w1, b1, w2, b2))
    assert jnp.allclose(out3, ref1, atol=1e-5, rtol=1e-5)

    print("KERNEL_OK")
</pallas_src>

<mosaic_0001>
module attributes {stable_mosaic.version = 11 : i64} {
  func.func @_mlp_kernel(%arg0: i32, %arg1: memref<24x128xf32, #tpu.memory_space<vmem>>, %arg2: memref<24x128xf32, #tpu.memory_space<vmem>>, %arg3: memref<24x128xf32, #tpu.memory_space<vmem>>, %arg4: memref<1xf32, #tpu.memory_space<smem>>, %arg5: memref<8x128xf32, #tpu.memory_space<vmem>>, %arg6: memref<8x128xf32, #tpu.memory_space<vmem>>) attributes {dimension_semantics = [#tpu.dimension_semantics<parallel>], iteration_bounds = array<i64: 2>, scalar_prefetch = 0 : i64, scratch_operands = 0 : i64, tpu.core_type = #tpu.core_type<tc>, window_params = [{pipeline_mode = #tpu.pipeline_mode<synchronous>, transform_indices = @transform_0, window_bounds = array<i64: 24, 128>}, {pipeline_mode = #tpu.pipeline_mode<synchronous>, transform_indices = @transform_1, window_bounds = array<i64: 24, 128>}, {pipeline_mode = #tpu.pipeline_mode<synchronous>, transform_indices = @transform_2, window_bounds = array<i64: 24, 128>}, {transform_indices = @transform_3, window_bounds = array<i64: 1>}, {transform_indices = @transform_4, window_bounds = array<i64: 8, 128>}, {transform_indices = @transform_5, window_bounds = array<i64: 8, 128>}]} {
    %c0 = arith.constant 0 : index
    %0 = memref.load %arg4[%c0] : memref<1xf32, #tpu.memory_space<smem>>
    %c0_0 = arith.constant 0 : index
    %c0_1 = arith.constant 0 : index
    %1 = vector.load %arg5[%c0_0, %c0_1] : memref<8x128xf32, #tpu.memory_space<vmem>>, vector<8x128xf32>
    %2 = vector.broadcast %0 : f32 to vector<8x128xf32>
    %cst = arith.constant 0.000000e+00 : f32
    %3 = vector.broadcast %cst : f32 to vector<8x128xf32>
    %c0_2 = arith.constant 0 : index
    %c0_3 = arith.constant 0 : index
    %4 = vector.load %arg1[%c0_2, %c0_3] : memref<24x128xf32, #tpu.memory_space<vmem>>, vector<1x128xf32>
    %5 = vector.broadcast %4 : vector<1x128xf32> to vector<8x128xf32>
    %6 = arith.mulf %1, %5 : vector<8x128xf32>
    %c0_4 = arith.constant 0 : index
    %c0_5 = arith.constant 0 : index
    %7 = vector.load %arg2[%c0_4, %c0_5] : memref<24x128xf32, #tpu.memory_space<vmem>>, vector<1x128xf32>
    %8 = vector.broadcast %7 : vector<1x128xf32> to vector<8x128xf32>
    %9 = arith.addf %6, %8 : vector<8x128xf32>
    %cst_6 = arith.constant 0.000000e+00 : f32
    %10 = vector.broadcast %cst_6 : f32 to vector<8x128xf32>
    %11 = arith.maximumf %9, %10 : vector<8x128xf32>
    %12 = arith.addf %2, %11 : vector<8x128xf32>
    %c1 = arith.constant 1 : index
    %c0_7 = arith.constant 0 : index
    %13 = vector.load %arg1[%c1, %c0_7] : memref<24x128xf32, #tpu.memory_space<vmem>>, vector<1x128xf32>
    %14 = vector.broadcast %13 : vector<1x128xf32> to vector<8x128xf32>
    %15 = arith.mulf %1, %14 : vector<8x128xf32>
    %c1_8 = arith.constant 1 : index
    %c0_9 = arith.constant 0 : index
    %16 = vector.load %arg2[%c1_8, %c0_9] : memref<24x128xf32, #tpu.memory_space<vmem>>, vector<1x128xf32>
    %17 = vector.broadcast %16 : vector<1x128xf32> to vector<8x128xf32>
    %18 = arith.addf %15, %17 : vector<8x128xf32>
    %cst_10 = arith.constant 0.000000e+00 : f32
    %19 = vector.broadcast %cst_10 : f32 to vector<8x128xf32>
    %20 = arith.maximumf %18, %19 : vector<8x128xf32>
    %21 = arith.addf %12, %20 : vector<8x128xf32>
    %c2 = arith.constant 2 : index
    %c0_11 = arith.constant 0 : index
    %22 = vector.load %arg1[%c2, %c0_11] : memref<24x128xf32, #tpu.memory_space<vmem>>, vector<1x128xf32>
    %23 = vector.broadcast %22 : vector<1x128xf32> to vector<8x128xf32>
    %24 = arith.mulf %1, %23 : vector<8x128xf32>
    %c2_12 = arith.constant 2 : index
    %c0_13 = arith.constant 0 : index
    %25 = vector.load %arg2[%c2_12, %c0_13] : memref<24x128xf32, #tpu.memory_space<vmem>>, vector<1x128xf32>
    %26 = vector.broadcast %25 : vector<1x128xf32> to vector<8x128xf32>
    %27 = arith.addf %24, %26 : vector<8x128xf32>
    %cst_14 = arith.constant 0.000000e+00 : f32
    %28 = vector.broadcast %cst_14 : f32 to vector<8x128xf32>
    %29 = arith.maximumf %27, %28 : vector<8x128xf32>
    %30 = arith.addf %21, %29 : vector<8x128xf32>
    %c3 = arith.constant 3 : index
    %c0_15 = arith.constant 0 : index
    %31 = vector.load %arg1[%c3, %c0_15] : memref<24x128xf32, #tpu.memory_space<vmem>>, vector<1x128xf32>
    %32 = vector.broadcast %31 : vector<1x128xf32> to vector<8x128xf32>
    %33 = arith.mulf %1, %32 : vector<8x128xf32>
    %c3_16 = arith.constant 3 : index
    %c0_17 = arith.constant 0 : index
    %34 = vector.load %arg2[%c3_16, %c0_17] : memref<24x128xf32, #tpu.memory_space<vmem>>, vector<1x128xf32>
    %35 = vector.broadcast %34 : vector<1x128xf32> to vector<8x128xf32>
    %36 = arith.addf %33, %35 : vector<8x128xf32>
    %cst_18 = arith.constant 0.000000e+00 : f32
    %37 = vector.broadcast %cst_18 : f32 to vector<8x128xf32>
    %38 = arith.maximumf %36, %37 : vector<8x128xf32>
    %39 = arith.addf %30, %38 : vector<8x128xf32>
    %c4 = arith.constant 4 : index
    %c0_19 = arith.constant 0 : index
    %40 = vector.load %arg1[%c4, %c0_19] : memref<24x128xf32, #tpu.memory_space<vmem>>, vector<1x128xf32>
    %41 = vector.broadcast %40 : vector<1x128xf32> to vector<8x128xf32>
    %42 = arith.mulf %1, %41 : vector<8x128xf32>
    %c4_20 = arith.constant 4 : index
    %c0_21 = arith.constant 0 : index
    %43 = vector.load %arg2[%c4_20, %c0_21] : memref<24x128xf32, #tpu.memory_space<vmem>>, vector<1x128xf32>
    %44 = vector.broadcast %43 : vector<1x128xf32> to vector<8x128xf32>
    %45 = arith.addf %42, %44 : vector<8x128xf32>
    %cst_22 = arith.constant 0.000000e+00 : f32
    %46 = vector.broadcast %cst_22 : f32 to vector<8x128xf32>
    %47 = arith.maximumf %45, %46 : vector<8x128xf32>
    %48 = arith.addf %39, %47 : vector<8x128xf32>
    %c5 = arith.constant 5 : index
    %c0_23 = arith.constant 0 : index
    %49 = vector.load %arg1[%c5, %c0_23] : memref<24x128xf32, #tpu.memory_space<vmem>>, vector<1x128xf32>
    %50 = vector.broadcast %49 : vector<1x128xf32> to vector<8x128xf32>
    %51 = arith.mulf %1, %50 : vector<8x128xf32>
    %c5_24 = arith.constant 5 : index
    %c0_25 = arith.constant 0 : index
    %52 = vector.load %arg2[%c5_24, %c0_25] : memref<24x128xf32, #tpu.memory_space<vmem>>, vector<1x128xf32>
    %53 = vector.broadcast %52 : vector<1x128xf32> to vector<8x128xf32>
    %54 = arith.addf %51, %53 : vector<8x128xf32>
    %cst_26 = arith.constant 0.000000e+00 : f32
    %55 = vector.broadcast %cst_26 : f32 to vector<8x128xf32>
    %56 = arith.maximumf %54, %55 : vector<8x128xf32>
    %57 = arith.addf %48, %56 : vector<8x128xf32>
    %c6 = arith.constant 6 : index
    %c0_27 = arith.constant 0 : index
    %58 = vector.load %arg1[%c6, %c0_27] : memref<24x128xf32, #tpu.memory_space<vmem>>, vector<1x128xf32>
    %59 = vector.broadcast %58 : vector<1x128xf32> to vector<8x128xf32>
    %60 = arith.mulf %1, %59 : vector<8x128xf32>
    %c6_28 = arith.constant 6 : index
    %c0_29 = arith.constant 0 : index
    %61 = vector.load %arg2[%c6_28, %c0_29] : memref<24x128xf32, #tpu.memory_space<vmem>>, vector<1x128xf32>
    %62 = vector.broadcast %61 : vector<1x128xf32> to vector<8x128xf32>
    %63 = arith.addf %60, %62 : vector<8x128xf32>
    %cst_30 = arith.constant 0.000000e+00 : f32
    %64 = vector.broadcast %cst_30 : f32 to vector<8x128xf32>
    %65 = arith.maximumf %63, %64 : vector<8x128xf32>
    %66 = arith.addf %57, %65 : vector<8x128xf32>
    %c7 = arith.constant 7 : index
    %c0_31 = arith.constant 0 : index
    %67 = vector.load %arg1[%c7, %c0_31] : memref<24x128xf32, #tpu.memory_space<vmem>>, vector<1x128xf32>
    %68 = vector.broadcast %67 : vector<1x128xf32> to vector<8x128xf32>
    %69 = arith.mulf %1, %68 : vector<8x128xf32>
    %c7_32 = arith.constant 7 : index
    %c0_33 = arith.constant 0 : index
    %70 = vector.load %arg2[%c7_32, %c0_33] : memref<24x128xf32, #tpu.memory_space<vmem>>, vector<1x128xf32>
    %71 = vector.broadcast %70 : vector<1x128xf32> to vector<8x128xf32>
    %72 = arith.addf %69, %71 : vector<8x128xf32>
    %cst_34 = arith.constant 0.000000e+00 : f32
    %73 = vector.broadcast %cst_34 : f32 to vector<8x128xf32>
    %74 = arith.maximumf %72, %73 : vector<8x128xf32>
    %75 = arith.addf %66, %74 : vector<8x128xf32>
    %c8 = arith.constant 8 : index
    %c0_35 = arith.constant 0 : index
    %76 = vector.load %arg1[%c8, %c0_35] : memref<24x128xf32, #tpu.memory_space<vmem>>, vector<1x128xf32>
    %77 = vector.broadcast %76 : vector<1x128xf32> to vector<8x128xf32>
    %78 = arith.mulf %1, %77 : vector<8x128xf32>
    %c8_36 = arith.constant 8 : index
    %c0_37 = arith.constant 0 : index
    %79 = vector.load %arg2[%c8_36, %c0_37] : memref<24x128xf32, #tpu.memory_space<vmem>>, vector<1x128xf32>
    %80 = vector.broadcast %79 : vector<1x128xf32> to vector<8x128xf32>
    %81 = arith.addf %78, %80 : vector<8x128xf32>
    %cst_38 = arith.constant 0.000000e+00 : f32
    %82 = vector.broadcast %cst_38 : f32 to vector<8x128xf32>
    %83 = arith.maximumf %81, %82 : vector<8x128xf32>
    %84 = arith.addf %75, %83 : vector<8x128xf32>
    %c9 = arith.constant 9 : index
    %c0_39 = arith.constant 0 : index
    %85 = vector.load %arg1[%c9, %c0_39] : memref<24x128xf32, #tpu.memory_space<vmem>>, vector<1x128xf32>
    %86 = vector.broadcast %85 : vector<1x128xf32> to vector<8x128xf32>
    %87 = arith.mulf %1, %86 : vector<8x128xf32>
    %c9_40 = arith.constant 9 : index
    %c0_41 = arith.constant 0 : index
    %88 = vector.load %arg2[%c9_40, %c0_41] : memref<24x128xf32, #tpu.memory_space<vmem>>, vector<1x128xf32>
    %89 = vector.broadcast %88 : vector<1x128xf32> to vector<8x128xf32>
    %90 = arith.addf %87, %89 : vector<8x128xf32>
    %cst_42 = arith.constant 0.000000e+00 : f32
    %91 = vector.broadcast %cst_42 : f32 to vector<8x128xf32>
    %92 = arith.maximumf %90, %91 : vector<8x128xf32>
    %93 = arith.addf %84, %92 : vector<8x128xf32>
    %c10 = arith.constant 10 : index
    %c0_43 = arith.constant 0 : index
    %94 = vector.load %arg1[%c10, %c0_43] : memref<24x128xf32, #tpu.memory_space<vmem>>, vector<1x128xf32>
    %95 = vector.broadcast %94 : vector<1x128xf32> to vector<8x128xf32>
    %96 = arith.mulf %1, %95 : vector<8x128xf32>
    %c10_44 = arith.constant 10 : index
    %c0_45 = arith.constant 0 : index
    %97 = vector.load %arg2[%c10_44, %c0_45] : memref<24x128xf32, #tpu.memory_space<vmem>>, vector<1x128xf32>
    %98 = vector.broadcast %97 : vector<1x128xf32> to vector<8x128xf32>
    %99 = arith.addf %96, %98 : vector<8x128xf32>
    %cst_46 = arith.constant 0.000000e+00 : f32
    %100 = vector.broadcast %cst_46 : f32 to vector<8x128xf32>
    %101 = arith.minimumf %99, %100 : vector<8x128xf32>
    %102 = arith.addf %3, %101 : vector<8x128xf32>
    %c11 = arith.constant 11 : index
    %c0_47 = arith.constant 0 : index
    %103 = vector.load %arg1[%c11, %c0_47] : memref<24x128xf32, #tpu.memory_space<vmem>>, vector<1x128xf32>
    %104 = vector.broadcast %103 : vector<1x128xf32> to vector<8x128xf32>
    %105 = arith.mulf %1, %104 : vector<8x128xf32>
    %c11_48 = arith.constant 11 : index
    %c0_49 = arith.constant 0 : index
    %106 = vector.load %arg2[%c11_48, %c0_49] : memref<24x128xf32, #tpu.memory_space<vmem>>, vector<1x128xf32>
    %107 = vector.broadcast %106 : vector<1x128xf32> to vector<8x128xf32>
    %108 = arith.addf %105, %107 : vector<8x128xf32>
    %cst_50 = arith.constant 0.000000e+00 : f32
    %109 = vector.broadcast %cst_50 : f32 to vector<8x128xf32>
    %110 = arith.minimumf %108, %109 : vector<8x128xf32>
    %111 = arith.addf %102, %110 : vector<8x128xf32>
    %c12 = arith.constant 12 : index
    %c0_51 = arith.constant 0 : index
    %112 = vector.load %arg1[%c12, %c0_51] : memref<24x128xf32, #tpu.memory_space<vmem>>, vector<1x128xf32>
    %113 = vector.broadcast %112 : vector<1x128xf32> to vector<8x128xf32>
    %114 = arith.mulf %1, %113 : vector<8x128xf32>
    %c12_52 = arith.constant 12 : index
    %c0_53 = arith.constant 0 : index
    %115 = vector.load %arg2[%c12_52, %c0_53] : memref<24x128xf32, #tpu.memory_space<vmem>>, vector<1x128xf32>
    %116 = vector.broadcast %115 : vector<1x128xf32> to vector<8x128xf32>
    %117 = arith.addf %114, %116 : vector<8x128xf32>
    %cst_54 = arith.constant 0.000000e+00 : f32
    %118 = vector.broadcast %cst_54 : f32 to vector<8x128xf32>
    %119 = arith.minimumf %117, %118 : vector<8x128xf32>
    %120 = arith.addf %111, %119 : vector<8x128xf32>
    %c13 = arith.constant 13 : index
    %c0_55 = arith.constant 0 : index
    %121 = vector.load %arg1[%c13, %c0_55] : memref<24x128xf32, #tpu.memory_space<vmem>>, vector<1x128xf32>
    %122 = vector.broadcast %121 : vector<1x128xf32> to vector<8x128xf32>
    %123 = arith.mulf %1, %122 : vector<8x128xf32>
    %c13_56 = arith.constant 13 : index
    %c0_57 = arith.constant 0 : index
    %124 = vector.load %arg2[%c13_56, %c0_57] : memref<24x128xf32, #tpu.memory_space<vmem>>, vector<1x128xf32>
    %125 = vector.broadcast %124 : vector<1x128xf32> to vector<8x128xf32>
    %126 = arith.addf %123, %125 : vector<8x128xf32>
    %cst_58 = arith.constant 0.000000e+00 : f32
    %127 = vector.broadcast %cst_58 : f32 to vector<8x128xf32>
    %128 = arith.minimumf %126, %127 : vector<8x128xf32>
    %129 = arith.addf %120, %128 : vector<8x128xf32>
    %c14 = arith.constant 14 : index
    %c0_59 = arith.constant 0 : index
    %130 = vector.load %arg1[%c14, %c0_59] : memref<24x128xf32, #tpu.memory_space<vmem>>, vector<1x128xf32>
    %131 = vector.broadcast %130 : vector<1x128xf32> to vector<8x128xf32>
    %132 = arith.mulf %1, %131 : vector<8x128xf32>
    %c14_60 = arith.constant 14 : index
    %c0_61 = arith.constant 0 : index
    %133 = vector.load %arg2[%c14_60, %c0_61] : memref<24x128xf32, #tpu.memory_space<vmem>>, vector<1x128xf32>
    %134 = vector.broadcast %133 : vector<1x128xf32> to vector<8x128xf32>
    %135 = arith.addf %132, %134 : vector<8x128xf32>
    %cst_62 = arith.constant 0.000000e+00 : f32
    %136 = vector.broadcast %cst_62 : f32 to vector<8x128xf32>
    %137 = arith.minimumf %135, %136 : vector<8x128xf32>
    %138 = arith.addf %129, %137 : vector<8x128xf32>
    %c15 = arith.constant 15 : index
    %c0_63 = arith.constant 0 : index
    %139 = vector.load %arg1[%c15, %c0_63] : memref<24x128xf32, #tpu.memory_space<vmem>>, vector<1x128xf32>
    %140 = vector.broadcast %139 : vector<1x128xf32> to vector<8x128xf32>
    %141 = arith.mulf %1, %140 : vector<8x128xf32>
    %c15_64 = arith.constant 15 : index
    %c0_65 = arith.constant 0 : index
    %142 = vector.load %arg2[%c15_64, %c0_65] : memref<24x128xf32, #tpu.memory_space<vmem>>, vector<1x128xf32>
    %143 = vector.broadcast %142 : vector<1x128xf32> to vector<8x128xf32>
    %144 = arith.addf %141, %143 : vector<8x128xf32>
    %cst_66 = arith.constant 0.000000e+00 : f32
    %145 = vector.broadcast %cst_66 : f32 to vector<8x128xf32>
    %146 = arith.minimumf %144, %145 : vector<8x128xf32>
    %147 = arith.addf %138, %146 : vector<8x128xf32>
    %c16 = arith.constant 16 : index
    %c0_67 = arith.constant 0 : index
    %148 = vector.load %arg1[%c16, %c0_67] : memref<24x128xf32, #tpu.memory_space<vmem>>, vector<1x128xf32>
    %149 = vector.broadcast %148 : vector<1x128xf32> to vector<8x128xf32>
    %150 = arith.mulf %1, %149 : vector<8x128xf32>
    %c16_68 = arith.constant 16 : index
    %c0_69 = arith.constant 0 : index
    %151 = vector.load %arg2[%c16_68, %c0_69] : memref<24x128xf32, #tpu.memory_space<vmem>>, vector<1x128xf32>
    %152 = vector.broadcast %151 : vector<1x128xf32> to vector<8x128xf32>
    %153 = arith.addf %150, %152 : vector<8x128xf32>
    %cst_70 = arith.constant 0.000000e+00 : f32
    %154 = vector.broadcast %cst_70 : f32 to vector<8x128xf32>
    %155 = arith.minimumf %153, %154 : vector<8x128xf32>
    %156 = arith.addf %147, %155 : vector<8x128xf32>
    %c17 = arith.constant 17 : index
    %c0_71 = arith.constant 0 : index
    %157 = vector.load %arg1[%c17, %c0_71] : memref<24x128xf32, #tpu.memory_space<vmem>>, vector<1x128xf32>
    %158 = vector.broadcast %157 : vector<1x128xf32> to vector<8x128xf32>
    %159 = arith.mulf %1, %158 : vector<8x128xf32>
    %c17_72 = arith.constant 17 : index
    %c0_73 = arith.constant 0 : index
    %160 = vector.load %arg2[%c17_72, %c0_73] : memref<24x128xf32, #tpu.memory_space<vmem>>, vector<1x128xf32>
    %161 = vector.broadcast %160 : vector<1x128xf32> to vector<8x128xf32>
    %162 = arith.addf %159, %161 : vector<8x128xf32>
    %cst_74 = arith.constant 0.000000e+00 : f32
    %163 = vector.broadcast %cst_74 : f32 to vector<8x128xf32>
    %164 = arith.minimumf %162, %163 : vector<8x128xf32>
    %165 = arith.addf %156, %164 : vector<8x128xf32>
    %c18 = arith.constant 18 : index
    %c0_75 = arith.constant 0 : index
    %166 = vector.load %arg1[%c18, %c0_75] : memref<24x128xf32, #tpu.memory_space<vmem>>, vector<1x128xf32>
    %167 = vector.broadcast %166 : vector<1x128xf32> to vector<8x128xf32>
    %168 = arith.mulf %1, %167 : vector<8x128xf32>
    %c18_76 = arith.constant 18 : index
    %c0_77 = arith.constant 0 : index
    %169 = vector.load %arg2[%c18_76, %c0_77] : memref<24x128xf32, #tpu.memory_space<vmem>>, vector<1x128xf32>
    %170 = vector.broadcast %169 : vector<1x128xf32> to vector<8x128xf32>
    %171 = arith.addf %168, %170 : vector<8x128xf32>
    %cst_78 = arith.constant 0.000000e+00 : f32
    %172 = vector.broadcast %cst_78 : f32 to vector<8x128xf32>
    %173 = arith.minimumf %171, %172 : vector<8x128xf32>
    %174 = arith.addf %165, %173 : vector<8x128xf32>
    %c19 = arith.constant 19 : index
    %c0_79 = arith.constant 0 : index
    %175 = vector.load %arg1[%c19, %c0_79] : memref<24x128xf32, #tpu.memory_space<vmem>>, vector<1x128xf32>
    %176 = vector.broadcast %175 : vector<1x128xf32> to vector<8x128xf32>
    %177 = arith.mulf %1, %176 : vector<8x128xf32>
    %c19_80 = arith.constant 19 : index
    %c0_81 = arith.constant 0 : index
    %178 = vector.load %arg2[%c19_80, %c0_81] : memref<24x128xf32, #tpu.memory_space<vmem>>, vector<1x128xf32>
    %179 = vector.broadcast %178 : vector<1x128xf32> to vector<8x128xf32>
    %180 = arith.addf %177, %179 : vector<8x128xf32>
    %cst_82 = arith.constant 0.000000e+00 : f32
    %181 = vector.broadcast %cst_82 : f32 to vector<8x128xf32>
    %182 = arith.minimumf %180, %181 : vector<8x128xf32>
    %183 = arith.addf %174, %182 : vector<8x128xf32>
    %184 = arith.addf %93, %183 : vector<8x128xf32>
    %c0_83 = arith.constant 0 : index
    %c0_84 = arith.constant 0 : index
    %185 = vector.load %arg6[%c0_83, %c0_84] : memref<8x128xf32, #tpu.memory_space<vmem>>, vector<8x128xf32>
    tpu.vector_store %arg6[%c0_83, %c0_84], %184 {strides = array<i32>} : memref<8x128xf32, #tpu.memory_space<vmem>>, vector<8x128xf32>,
    return
  }
  func.func @transform_0(%arg0: i32) -> (i32, i32) {
    %c0_i32 = arith.constant 0 : i32
    %c0_i32_0 = arith.constant 0 : i32
    %c0_i32_1 = arith.constant 0 : i32
    return %c0_i32, %c0_i32_0 : i32, i32
  }
  func.func @transform_1(%arg0: i32) -> (i32, i32) {
    %c0_i32 = arith.constant 0 : i32
    %c0_i32_0 = arith.constant 0 : i32
    %c0_i32_1 = arith.constant 0 : i32
    return %c0_i32, %c0_i32_0 : i32, i32
  }
  func.func @transform_2(%arg0: i32) -> (i32, i32) {
    %c0_i32 = arith.constant 0 : i32
    %c0_i32_0 = arith.constant 0 : i32
    %c0_i32_1 = arith.constant 0 : i32
    return %c0_i32, %c0_i32_0 : i32, i32
  }
  func.func @transform_3(%arg0: i32) -> i32 {
    %c0_i32 = arith.constant 0 : i32
    %c0_i32_0 = arith.constant 0 : i32
    return %c0_i32 : i32
  }
  func.func @transform_4(%arg0: i32) -> (i32, i32) {
    %c0_i32 = arith.constant 0 : i32
    %c0_i32_0 = arith.constant 0 : i32
    return %arg0, %c0_i32 : i32, i32
  }
  func.func @transform_5(%arg0: i32) -> (i32, i32) {
    %c0_i32 = arith.constant 0 : i32
    %c0_i32_0 = arith.constant 0 : i32
    return %arg0, %c0_i32 : i32, i32
  }
}

</mosaic_0001>

<bundles_post_ra>
// kernel: tpu_custom_call.1
= control target key start
LH: loop header
LB: loop body
LE: loop exit
PB: predicated region body
PF: predicated region fallthrough
CT: control target
= control target key end

     0   :  { %s1128_s0 = inlined_call_operand.hbm [shape: f32[24,128], index: 0, kind: input, shape index: {}]   ;;  %s1129_s1 = inlined_call_operand.hbm [shape: f32[24,128], index: 1, kind: input, shape index: {}]   ;;  %s1130_s2 = inlined_call_operand.hbm [shape: f32[24,128], index: 2, kind: input, shape index: {}]   ;;  %s1131_s3 = inlined_call_operand.<no memory space> [shape: f32[1], index: 3, kind: input, shape index: {}]   ;;  %s1132_s4 = inlined_call_operand.hbm [shape: f32[16,128], index: 4, kind: input, shape index: {}]   ;;  %s1133_s5 = inlined_call_operand.hbm [shape: f32[16,128], index: 5, kind: output, shape index: {}]  }
   0x1   :  { %10 = sst [smem:[#allocation2]] %s1131_s3 }
   0x2   :  { %11 = vsyncpa [#allocation4], 0 }
   0x3   :  { %12 = vsyncpa [#allocation7], 0 }
   0x4   :  { %13 = vsyncpa [#allocation10], 0 }
   0x5   :  { %15 = vsyncpa [#allocation10 + $0x1], 0 }
   0x6   :  { %16 = vsyncpa [#allocation5], 0 }
   0x7   :  { %18 = vsyncpa [#allocation5 + $0x1], 0  ;;  %s946_s20 = smov 0   ;;  %s948_s21 = smov 0  }
   0x8   :  { %s950_s22 = smov 0   ;;  %s952_s23 = smov 0  }
   0x9 LB: > { %s967_s3 = sadd.s32 4294967295, %s906_s23   ;;  %p576_p0 = scmp.ge.s32.totalorder %s906_s23, 1  ;;  %s906_s23 = sphi %s952_s23, %s1144_s23   ;;  %s902_s22 = sphi %s950_s22, %s1143_s22   ;;  %s898_s21 = sphi %s948_s21, %s1142_s21   ;;  %s894_s20 = sphi %s946_s20, %s1141_s20  }
   0xa   : > { %p129_p1 = scmp.eq.s32.totalorder %s967_s3, 0  ;;  %p165_p2 = scmp.lt.s32.totalorder %s906_s23, 3 }
   0xb   : > { %s190_s26 = sshll.u32 %s1129_s1, 4  ;;  %s908_s28 = smov [#allocation6]   ;;  %s191_s26 = int_to_ptr.hbm [resolvable:$true] %s190_s26 }
   0xc   : > { %p975_p3 = pnand %p576_p0, %p165_p2  ;;  %s192_s29 = sshll.u32 %s908_s28, 4  ;;  %s193_s29 = int_to_ptr.vmem [resolvable:$true] %s192_s29 }
   0xd   : > { %s176_s7 = sshll.u32 %s1128_s0, 4  ;;  %s204_s11 = sshll.u32 %s1130_s2, 4  ;;  %s177_s7 = int_to_ptr.hbm [resolvable:$true] %s176_s7  ;;  %s205_s11 = int_to_ptr.hbm [resolvable:$true] %s204_s11 }
   0xe   : > { %p609_p5 = pneg %p975_p3  ;;  %s909_s12 = smov [#allocation3]  }
   0xf   : > { %s178_s13 = sshll.u32 %s909_s12, 4  ;;  %s910_s14 = smov 128   ;;  %s179_s13 = int_to_ptr.vmem [resolvable:$true] %s178_s13 }
  0x10   : > { %p987_p6 = pnand %p609_p5, %p129_p1  ;;  %s911_s15 = smov 8  }
  0x11   : > { %s912_s16 = smov [#allocation8]   ;;  %s575_s18 = sadd.s32 4294967294, %s906_s23  }
  0x12   : > { %615 = dma.hbm_to_vmem [thread:$0]  (!%p987_p6), %s191_s26, 384, %s193_s29, [#allocation7], %s910_s14, %s910_s14, %s911_s15  }
  0x13   : > { %612 = dma.hbm_to_vmem [thread:$0]  (!%p987_p6), %s177_s7, 384, %s179_s13, [#allocation4], %s910_s14, %s910_s14, %s911_s15  }
  0x14   : > { %s206_s17 = sshll.u32 %s912_s16, 4  ;;  %s1002_s19 = sadd.s32 1, %s906_s23   ;;  %s207_s17 = int_to_ptr.vmem [resolvable:$true] %s206_s17 }
  0x15   : > { %618 = dma.hbm_to_vmem [thread:$0]  (!%p987_p6), %s205_s11, 384, %s207_s17, [#allocation7], %s910_s14, %s910_s14, %s911_s15  }
  0x16   : > { %s115_s24 = sadd.s32 1, %s902_s22  ;;  %s112_s25 = ssub.s32 %s906_s23, %s1002_s19 }
  0x17   : > { %p122_p7 = scmp.ne.s32.totalorder %s902_s22, %s898_s21  ;;  %p113_p8 = scmp.eq.s32.totalorder %s112_s25, 0 }
  0x18   : > { %p123_p9 = scmp.eq.s32.totalorder %s906_s23, 0  ;;  %p128_p10 = scmp.ne.s32.totalorder %s898_s21, %s894_s20 }
  0x19   : > { %p152_p11 = scmp.eq.s32.totalorder %s967_s3, 1  ;;  %p158_p0 = scmp.eq.s32.totalorder %s575_s18, 1 }
  0x1a   : > { %s1014_s26 = scalar_select %p113_p8, %s902_s22, %s115_s24  }
  0x1b   : > { %p1018_p12 = por %p129_p1, %p128_p10  ;;  %p1022_p13 = por %p152_p11, %p122_p7 }
  0x1c   : > { %p124_p2 = por %p123_p9, %p122_p7  ;;  %s223_s30 = sand.u32 1, %s902_s22  }
  0x1d   : > { %p1027_p5 = por %p158_p0, %p128_p10  ;;  %p630_p6 = scmp.lt.s32.totalorder %s906_s23, 2 }
  0x1e   : > { %s581_s7 = sshll.u32 %s223_s30, 3  ;;  %s582_s8 = sshll.u32 %s906_s23, 3 }
  0x1f   : > { %s231_s11 = scalar_lea.hbm %s1132_s4, %s582_s8  ;;  %s227_s13 = scalar_lea.vmem [#allocation9], %s581_s7 }
  0x20   : > { %s233_s12 = sshll.u32 %s231_s11, 4  ;;  %s235_s14 = sshll.u32 %s227_s13, 4  ;;  %s234_s12 = int_to_ptr.hbm [resolvable:$true] %s233_s12  ;;  %s236_s14 = int_to_ptr.vmem [resolvable:$true] %s235_s14 }
  0x21   : > { %p1036_p8 = pnand %p630_p6, %p124_p2  ;;  %s224_s16 = scalar_lea.sflag [#allocation10], %s223_s30 }
  0x22   : > { %s802_s17 = sshra.s32 %s234_s12, 4  ;;  %s809_s7 = scalar_lea.hbm %s1132_s4, 16  ;;  %s803_s17 = int_to_ptr.hbm [resolvable:$true] %s802_s17 }
  0x23   : > { %s804_s18 = scalar_lea.hbm %s803_s17, 8  ;;  %p806_p9 = pneg %p1036_p8 }
  0x24   : > { %p805_p7 = scmp.ne.s32.totalorder %s803_s17, %s804_s18  ;;  %p810_p0 = scmp.lt.s32.totalorder %s803_s17, %s1132_s4 }
  0x25   : > { %p811_p2 = scmp.lt.s32.totalorder %s809_s7, %s804_s18 }
  0x26   : > { %p807_p10 = pnand %p806_p9, %p805_p7 }
  0x27   : > { %p812_p6 = por %p811_p2, %p810_p0 }
  0x28   : > { %p808_p11 = pneg %p807_p10 }
  0x2a   : > { %p813_p4 = pnand %p812_p6, %p808_p11 }
  0x2c   : > { %816 = shalt.err (!%p813_p4)
}
  0x2d   : > { %622 = dma.hbm_to_vmem [thread:$0]  (!%p1036_p8), %s234_s12, 128, %s236_s14, %s224_s16  }
  0x2e   : > { %244 = sbr.rel (%p975_p3) target bundleno = 96 (0x60), region = 40 }
  0x33   : > { %877 = dma.done.wait (%p129_p1), [#allocation4], 384  }
  0x34   : > { %879 = vsyncadd (%p129_p1), [#allocation4], 4294966912 }
  0x35   : > { %881 = dma.done.wait (%p129_p1), [#allocation7], 768  }
  0x36   : > { %883 = vsyncadd (%p129_p1), [#allocation7], 4294966528  ;;  %s1061_s30 = sand.u32 1, %s898_s21  }
  0x37   : > { %s587_s27 = sshll.u32 %s1061_s30, 3  ;;  %s262_s10 = scalar_lea.sflag [#allocation10], %s1061_s30 }
  0x38   : > { %s265_s11 = scalar_lea.vmem [#allocation9], %s587_s27 }
  0x39   : > { %885 = dma.done.wait (%p1018_p12), %s262_s10, 128  }
  0x3a   : > { %887 = vsyncadd (%p1018_p12), %s262_s10, 4294967168  ;;  %s293_s12 = sld [smem:[#allocation2]]  ;;  %v1071_v0 = vld [vmem:[%s265_s11] sm:$0xff]  ;;  %v672_v1 = vld [vmem:[#allocation3] ss:$0 sm:$0xff]  ;;  %s590_s28 = sshll.u32 %s967_s3, 3 }
  0x3b   : > { %v673_v2 = vld [vmem:[#allocation6] ss:$0 sm:$0xff]  ;;  %v298_v3 = vmul.f32 %v672_v1, %v1071_v0  ;;  %v674_v4 = vld [vmem:[#allocation3 + $0x1] ss:$0 sm:$0xff]  ;;  %v675_v5 = vld [vmem:[#allocation6 + $0x1] ss:$0 sm:$0xff]  ;;  %s469_s15 = scalar_lea.hbm %s1133_s5, %s590_s28 }
  0x3c   : > { %v676_v6 = vld [vmem:[#allocation3 + $0x2] ss:$0 sm:$0xff]  ;;  %v306_v8 = vmul.f32 %v674_v4, %v1071_v0  ;;  %v677_v9 = vld [vmem:[#allocation6 + $0x2] ss:$0 sm:$0xff]  ;;  %v678_v10 = vld [vmem:[#allocation3 + $0x3] ss:$0 sm:$0xff] }
  0x3d   : > { %v301_v7 = vadd.f32 %v673_v2, %v298_v3  ;;  %v314_v12 = vmul.f32 %v676_v6, %v1071_v0  ;;  %v679_v13 = vld [vmem:[#allocation6 + $0x3] ss:$0 sm:$0xff]  ;;  %v322_v16 = vmul.f32 %v678_v10, %v1071_v0  ;;  %v680_v17 = vld [vmem:[#allocation3 + $0x4] ss:$0 sm:$0xff]  ;;  %v681_v19 = vld [vmem:[#allocation6 + $0x4] ss:$0 sm:$0xff] }
  0x3e   : > { %v309_v15 = vadd.f32 %v675_v5, %v306_v8  ;;  %v682_v20 = vld [vmem:[#allocation3 + $0x5] ss:$0 sm:$0xff]  ;;  %v330_v24 = vmul.f32 %v680_v17, %v1071_v0  ;;  %v683_v29 = vld [vmem:[#allocation6 + $0x5] ss:$0 sm:$0xff]  ;;  %v684_v32 = vld [vmem:[#allocation3 + $0x6] ss:$0 sm:$0xff] }
  0x3f   : > { %v302_v14 = vmax.f32 %v301_v7, 0.0  ;;  %v317_v18 = vadd.f32 %v677_v9, %v314_v12  ;;  %v325_v23 = vadd.f32 %v679_v13, %v322_v16  ;;  %v338_v28 = vmul.f32 %v682_v20, %v1071_v0  ;;  %v685_v33 = vld [vmem:[#allocation6 + $0x6] ss:$0 sm:$0xff]  ;;  %v686_v36 = vld [vmem:[#allocation3 + $0x7] ss:$0 sm:$0xff]  ;;  %s292_s16 = scalar_lea.vmem [#allocation11], %s587_s27 }
  0x40   : > { %v295_v11 = vstv %s293_s12  ;;  %v310_v22 = vmax.f32 %v309_v15, 0.0  ;;  %v333_v27 = vadd.f32 %v681_v19, %v330_v24  ;;  %v346_v38 = vmul.f32 %v684_v32, %v1071_v0  ;;  %v692_v39 = vld [vmem:[#allocation3 + $0xa] ss:$0 sm:$0xff]  ;;  %v687_v40 = vld [vmem:[#allocation6 + $0x7] ss:$0 sm:$0xff]  ;;  %s471_s17 = sshll.u32 %s292_s16, 4  ;;  %s472_s17 = int_to_ptr.vmem [resolvable:$true] %s471_s17 }
  0x41   : > { %v303_v21 = vadd.f32 %v302_v14, %v295_v11  ;;  %v318_v25 = vmax.f32 %v317_v18, 0.0  ;;  %v326_v31 = vmax.f32 %v325_v23, 0.0  ;;  %v341_v35 = vadd.f32 %v683_v29, %v338_v28  ;;  %v688_v41 = vld [vmem:[#allocation3 + $0x8] ss:$0 sm:$0xff]  ;;  %v693_v42 = vld [vmem:[#allocation6 + $0xa] ss:$0 sm:$0xff] }
  0x42   : > { %v334_v34 = vmax.f32 %v333_v27, 0.0  ;;  %v378_v43 = vmul.f32 %v692_v39, %v1071_v0  ;;  %v694_v44 = vld [vmem:[#allocation3 + $0xb] ss:$0 sm:$0xff]  ;;  %v695_v45 = vld [vmem:[#allocation6 + $0xb] ss:$0 sm:$0xff]  ;;  %v354_v47 = vmul.f32 %v686_v36, %v1071_v0  ;;  %v349_v50 = vadd.f32 %v685_v33, %v346_v38  ;;  %s473_s18 = sshll.u32 %s469_s15, 4  ;;  %s474_s18 = int_to_ptr.hbm [resolvable:$true] %s473_s18 }
  0x43   : > { %v311_v26 = vadd.f32 %v310_v22, %v303_v21  ;;  %v342_v46 = vmax.f32 %v341_v35, 0.0  ;;  %v696_v48 = vld [vmem:[#allocation3 + $0xc] ss:$0 sm:$0xff]  ;;  %v689_v51 = vld [vmem:[#allocation6 + $0x8] ss:$0 sm:$0xff]  ;;  %v386_v53 = vmul.f32 %v694_v44, %v1071_v0  ;;  %v362_v55 = vmul.f32 %v688_v41, %v1071_v0  ;;  %s459_s3 = scalar_lea.sflag [#allocation5], %s1061_s30 }
  0x44   : > { %v381_v52 = vadd.f32 %v693_v42, %v378_v43  ;;  %v697_v54 = vld [vmem:[#allocation6 + $0xc] ss:$0 sm:$0xff]  ;;  %v690_v56 = vld [vmem:[#allocation3 + $0x9] ss:$0 sm:$0xff]  ;;  %v394_v57 = vmul.f32 %v696_v48, %v1071_v0  ;;  %v698_v58 = vld [vmem:[#allocation3 + $0xd] ss:$0 sm:$0xff]  ;;  %v357_v62 = vadd.f32 %v687_v40, %v354_v47 }
  0x45   : > { %v319_v30 = vadd.f32 %v318_v25, %v311_v26  ;;  %v389_v60 = vadd.f32 %v695_v45, %v386_v53  ;;  %v699_v61 = vld [vmem:[#allocation6 + $0xd] ss:$0 sm:$0xff]  ;;  %v402_v1 = vmul.f32 %v698_v58, %v1071_v0  ;;  %v700_v2 = vld [vmem:[#allocation3 + $0xe] ss:$0 sm:$0xff]  ;;  %v701_v3 = vld [vmem:[#allocation6 + $0xe] ss:$0 sm:$0xff]  ;;  %v365_v8 = vadd.f32 %v689_v51, %v362_v55 }
  0x46   : > { %v382_v59 = vmin.f32 %v381_v52, 0.0  ;;  %v397_v63 = vadd.f32 %v697_v54, %v394_v57  ;;  %v350_v5 = vmax.f32 %v349_v50, 0.0  ;;  %v702_v7 = vld [vmem:[#allocation3 + $0xf] ss:$0 sm:$0xff]  ;;  %v691_v9 = vld [vmem:[#allocation6 + $0x9] ss:$0 sm:$0xff]  ;;  %v410_v12 = vmul.f32 %v700_v2, %v1071_v0 }
  0x47   : > { %v327_v37 = vadd.f32 %v326_v31, %v319_v30  ;;  %v390_v6 = vmin.f32 %v389_v60, 0.0  ;;  %v405_v11 = vadd.f32 %v699_v61, %v402_v1  ;;  %v703_v13 = vld [vmem:[#allocation6 + $0xf] ss:$0 sm:$0xff]  ;;  %v418_v15 = vmul.f32 %v702_v7, %v1071_v0  ;;  %v704_v16 = vld [vmem:[#allocation3 + $0x10] ss:$0 sm:$0xff]  ;;  %s846_s24 = sshra.s32 %s474_s18, 4  ;;  %s847_s24 = int_to_ptr.hbm [resolvable:$true] %s846_s24 }
  0x48   : > { %v398_v10 = vmin.f32 %v397_v63, 0.0  ;;  %v358_v17 = vmax.f32 %v357_v62, 0.0  ;;  %v370_v18 = vmul.f32 %v690_v56, %v1071_v0  ;;  %v413_v20 = vadd.f32 %v701_v3, %v410_v12  ;;  %v705_v21 = vld [vmem:[#allocation6 + $0x10] ss:$0 sm:$0xff]  ;;  %v706_v26 = vld [vmem:[#allocation3 + $0x11] ss:$0 sm:$0xff]  ;;  %p853_p12 = scmp.lt.s32.totalorder %s847_s24, %s1133_s5 }
  0x49   : > { %v335_v49 = vadd.f32 %v334_v34, %v327_v37  ;;  %v391_v14 = vadd.f32 %v390_v6, %v382_v59  ;;  %v406_v19 = vmin.f32 %v405_v11, 0.0  ;;  %v421_v24 = vadd.f32 %v703_v13, %v418_v15  ;;  %v707_v27 = vld [vmem:[#allocation6 + $0x11] ss:$0 sm:$0xff]  ;;  %v708_v30 = vld [vmem:[#allocation3 + $0x12] ss:$0 sm:$0xff]  ;;  %s848_s25 = scalar_lea.hbm %s847_s24, 8 }
  0x4a   : > { %v426_v25 = vmul.f32 %v704_v16, %v1071_v0  ;;  %v366_v28 = vmax.f32 %v365_v8, 0.0  ;;  %v414_v29 = vmin.f32 %v413_v20, 0.0  ;;  %v434_v34 = vmul.f32 %v706_v26, %v1071_v0  ;;  %v709_v35 = vld [vmem:[#allocation6 + $0x12] ss:$0 sm:$0xff]  ;;  %v710_v38 = vld [vmem:[#allocation3 + $0x13] ss:$0 sm:$0xff]  ;;  %p849_p1 = scmp.ne.s32.totalorder %s847_s24, %s848_s25 }
  0x4b   : > { %v343_v4 = vadd.f32 %v342_v46, %v335_v49  ;;  %v399_v23 = vadd.f32 %v398_v10, %v391_v14  ;;  %v422_v32 = vmin.f32 %v421_v24, 0.0  ;;  %v373_v36 = vadd.f32 %v691_v9, %v370_v18  ;;  %v711_v43 = vld [vmem:[#allocation6 + $0x13] ss:$0 sm:$0xff]  ;;  %s852_s9 = scalar_lea.hbm %s1133_s5, 16 }
  0x4c   : > { %v429_v33 = vadd.f32 %v705_v21, %v426_v25  ;;  %v442_v37 = vmul.f32 %v708_v30, %v1071_v0  ;;  %v437_v42 = vadd.f32 %v707_v27, %v434_v34  ;;  %v450_v45 = vmul.f32 %v710_v38, %v1071_v0  ;;  %p850_p3 = pnand %p849_p1, %p1022_p13  ;;  %p854_p8 = scmp.lt.s32.totalorder %s852_s9, %s848_s25 }
  0x4d   : > { %v351_v22 = vadd.f32 %v350_v5, %v343_v4  ;;  %v407_v31 = vadd.f32 %v406_v19, %v399_v23  ;;  %v374_v50 = vmax.f32 %v373_v36, 0.0 }
  0x4e   : > { %v430_v41 = vmin.f32 %v429_v33, 0.0  ;;  %v445_v44 = vadd.f32 %v709_v35, %v442_v37  ;;  %v438_v47 = vmin.f32 %v437_v42, 0.0  ;;  %v453_v48 = vadd.f32 %v711_v43, %v450_v45  ;;  %p851_p4 = pneg %p850_p3  ;;  %p855_p7 = por %p854_p8, %p853_p12 }
  0x4f   : > { %v359_v39 = vadd.f32 %v358_v17, %v351_v22  ;;  %v415_v40 = vadd.f32 %v414_v29, %v407_v31 }
  0x50   : > { %v446_v52 = vmin.f32 %v445_v44, 0.0  ;;  %v454_v54 = vmin.f32 %v453_v48, 0.0  ;;  %p856_p9 = pnand %p855_p7, %p851_p4 }
  0x51   : > { %v423_v46 = vadd.f32 %v422_v32, %v415_v40  ;;  %v367_v49 = vadd.f32 %v366_v28, %v359_v39 }
  0x53   : > { %v431_v51 = vadd.f32 %v430_v41, %v423_v46  ;;  %v375_v55 = vadd.f32 %v374_v50, %v367_v49 }
  0x55   : > { %v439_v53 = vadd.f32 %v438_v47, %v431_v51 }
  0x57   : > { %v447_v56 = vadd.f32 %v446_v52, %v439_v53 }
  0x59   : > { %v455_v0 = vadd.f32 %v454_v54, %v447_v56 }
  0x5b   : > { %v456_v57 = vadd.f32 %v455_v0, %v375_v55 }
  0x5d   : > { %457 = vst [vmem:[%s292_s16] sm:$0xff] %v456_v57 }
  0x5e   : > { %859 = shalt.err (!%p856_p9)
}
  0x5f   : > { %607 = dma.vmem_to_hbm [thread:$0]  (%p1022_p13), %s472_s17, 128, %s474_s18, %s459_s3  }
  0x60 PF: > { %s485_s30 = sand.u32 1, %s894_s20   ;;  %p1140_p10 = scmp.ge.s32.totalorder %s906_s23, 2 }
  0x61   : > { %s486_s11 = scalar_lea.sflag [#allocation5], %s485_s30 }
  0x62   : > { %p624_p11 = pnand %p1140_p10, %p1027_p5 }
  0x64   : > { %p625_p0 = pneg %p624_p11 }
  0x66   : > { %889 = dma.done.wait (%p625_p0), %s486_s11, 128  }
  0x67   : > { %891 = vsyncadd (%p625_p0), %s486_s11, 4294967168  ;;  %p21_p2 = scmp.ge.s32.totalorder %s1002_s19, 4   ;;  %s1141_s20 = smov %s898_s21 }
  0x68   : > { %s1142_s21 = smov %s902_s22  ;;  %s1143_s22 = smov %s1014_s26 }
  0x69   : > { %s1144_s23 = smov %s1002_s19  ;;  %23 = sbr.rel (!%p21_p2) target bundleno = 9 (0x9), region = 98 }
  0x6e   :  { %492 = vsyncpa [#allocation4], 1 }
  0x6f   :  { %494 = vsyncpa [#allocation4 + $0x1], 1 }
  0x70   :  { %495 = vsyncpa [#allocation7], 1 }
  0x71   :  { %496 = vsyncpa [#allocation10], 1 }
  0x72   :  { %498 = vsyncpa [#allocation10 + $0x1], 1 }
  0x73   :  { %499 = vsyncpa [#allocation5], 1 }
  0x74   :  { %501 = vsyncpa [#allocation5 + $0x1], 1 }

</bundles_post_ra>
